<compile_context>
chip_gen: v7x
topology: tpu7x:2x2x1
jax: 0.10.0
libtpu: 0.0.40
codegen_flags: <defaults>
</compile_context>

<pallas_src>
import jax
import jax.numpy as jnp
from jax.experimental import pallas as pl
from jax.experimental.pallas import tpu as pltpu

PAD = 128                                   # lane-dense output / weight width
LAYER_DIMS = [(8, 16), (16, 32), (32, 64), (64, 8)]
# fan-in padded to the bf16 sublane tile (16 rows); rows are concatenated.
K_PAD = [16, 16, 32, 64]
ROW_OFFSETS = [0, 16, 32, 64]               # cumulative; all multiples of 16
TOTAL_ROWS = sum(K_PAD)                     # = 128 rows -> 32 KiB of bf16 weights
BATCH = 8
OUT_DIM = LAYER_DIMS[-1][1]

# Advisory cost hint for XLA scheduling around the custom call.
_FLOPS_EST = 2 * BATCH * PAD * sum(K_PAD)                       # ~262 KFLOP
_BYTES_EST = (BATCH * K_PAD[0] * 4          # input  (8,16)  f32
              + TOTAL_ROWS * PAD * 2        # weights (128,128) bf16
              + len(LAYER_DIMS) * PAD * 4   # biases (4,128) f32
              + BATCH * PAD * 4)            # output (8,128) f32


def mlp_kernel(x_ref, w_ref, b_ref, o_ref):
    # x_ref: (8, 16)   f32  — input, lanes 0:8 real, 8:16 zero.
    # w_ref: (128,128) bf16 — layer l occupies rows [ROW_OFFSETS[l] : +K_PAD[l]),
    #                         real weights in rows 0:fan_in / lanes 0:fan_out.
    # b_ref: (4, 128)  f32  — per-layer bias, zero-padded to 128 lanes.
    # o_ref: (8, 128)  f32  — real output in lanes 0:8.
    h = x_ref[...]                                           # (8, 16) f32
    n_layers = len(LAYER_DIMS)
    for l in range(n_layers):                                # unrolled at trace time
        kin, off = K_PAD[l], ROW_OFFSETS[l]
        w = w_ref[off:off + kin, :]                          # (kin, 128) bf16, tile-aligned
        z = jnp.dot(h[:, :kin].astype(jnp.bfloat16), w,      # MXU, f32 accumulate
                    preferred_element_type=jnp.float32)
        z = z + b_ref[l:l + 1, :]                            # f32 bias add on the VPU
        # ReLU after net1 / net2 / net3-output (net4's leading ReLU); not after net4.
        h = jnp.maximum(z, 0.0) if l < n_layers - 1 else z
    o_ref[...] = h


@jax.jit
def dummy_model_forward(x, w_packed, b_packed):
    """Fused forward: pad input, run the 4-layer MLP kernel, slice real lanes."""
    batch = x.shape[0]
    # Zero-pad the 8 input features to 16 lanes (fused into the jit; 512-byte DMA).
    xp = jnp.pad(x, ((0, 0), (0, K_PAD[0] - x.shape[1])))

    out_padded = pl.pallas_call(
        mlp_kernel,
        out_shape=jax.ShapeDtypeStruct((batch, PAD), jnp.float32),
        grid=(),
        in_specs=[
            pl.BlockSpec(xp.shape, lambda: (0, 0),
                         memory_space=pltpu.MemorySpace.VMEM),
            pl.BlockSpec(w_packed.shape, lambda: (0, 0),
                         memory_space=pltpu.MemorySpace.VMEM),
            pl.BlockSpec(b_packed.shape, lambda: (0, 0),
                         memory_space=pltpu.MemorySpace.VMEM),
        ],
        out_specs=pl.BlockSpec((batch, PAD), lambda: (0, 0),
                               memory_space=pltpu.MemorySpace.VMEM),
        cost_estimate=pl.CostEstimate(
            flops=_FLOPS_EST, transcendentals=0, bytes_accessed=_BYTES_EST),
    )(xp, w_packed, b_packed)

    # Real output lives in the first 8 lanes; slice inside the same jit.
    return out_padded[:, :OUT_DIM]


def pack_params(params):
    """Pack per-layer (W:(in,out), b:(1,out)) into:
         w_packed: (128, 128) bf16 — rows = concatenated fan-ins padded to 16,
         b_packed: (4, 128)   f32  — biases zero-padded to 128 lanes."""
    assert len(params) == len(LAYER_DIMS)
    w_packed = jnp.zeros((TOTAL_ROWS, PAD), jnp.float32)
    b_packed = jnp.zeros((len(params), PAD), jnp.float32)
    for l, (w, b) in enumerate(params):
        fin, fout = w.shape
        assert (fin, fout) == LAYER_DIMS[l], (fin, fout)
        assert fin <= K_PAD[l] and fout <= PAD
        assert ROW_OFFSETS[l] % 16 == 0 and ROW_OFFSETS[l] + K_PAD[l] <= TOTAL_ROWS
        off = ROW_OFFSETS[l]
        w_packed = w_packed.at[off:off + fin, :fout].set(w)
        b_packed = b_packed.at[l, :fout].set(b.reshape(-1))
    return w_packed.astype(jnp.bfloat16), b_packed


def init_params(key):
    """Deterministic init matching nn.Linear shapes (stored transposed: (in, out))."""
    params = []
    for fan_in, fan_out in LAYER_DIMS:
        key, kw, kb = jax.random.split(key, 3)
        bound = 1.0 / jnp.sqrt(fan_in)
        w = jax.random.uniform(kw, (fan_in, fan_out), jnp.float32, -bound, bound)
        b = jax.random.uniform(kb, (1, fan_out), jnp.float32, -bound, bound)
        params.append((w, b))
    return params


def reference_forward(x, params):
    """Pure-JAX reference mirroring the kernel numerics:
       bf16 matmul operands, f32 accumulation, f32 bias add."""
    bf = lambda a: a.astype(jnp.bfloat16)
    h = x
    for l, (w, b) in enumerate(params):
        h = jnp.dot(bf(h), bf(w), preferred_element_type=jnp.float32) + b.reshape(1, -1)
        if l < len(params) - 1:
            h = jnp.maximum(h, 0.0)
    return h


if __name__ == "__main__":
    key = jax.random.PRNGKey(0)
    key, kx = jax.random.split(key)

    # matches get_input(): torch.rand(8, 8)
    x = jax.random.uniform(kx, (BATCH, LAYER_DIMS[0][0]), jnp.float32)
    params = init_params(key)
    w_packed, b_packed = pack_params(params)

    out = dummy_model_forward(x, w_packed, b_packed)
    out = jax.block_until_ready(out)

    ref = reference_forward(x, params)
    assert out.shape == (BATCH, OUT_DIM), out.shape
    assert jnp.allclose(out, ref, atol=1e-2, rtol=1e-2), \
        "mismatch vs bf16-mirrored JAX reference"

    print("KERNEL_OK")
</pallas_src>

<mosaic_0001>
module attributes {stable_mosaic.version = 11 : i64} {
  func.func @mlp_kernel(%arg0: memref<8x16xf32, #tpu.memory_space<vmem>>, %arg1: memref<128x128xbf16, #tpu.memory_space<vmem>>, %arg2: memref<4x128xf32, #tpu.memory_space<vmem>>, %arg3: memref<8x128xf32, #tpu.memory_space<vmem>>) attributes {dimension_semantics = [], scalar_prefetch = 0 : i64, scratch_operands = 0 : i64, tpu.core_type = #tpu.core_type<tc>} {
    %c0 = arith.constant 0 : index
    %c0_0 = arith.constant 0 : index
    %0 = vector.load %arg0[%c0, %c0_0] : memref<8x16xf32, #tpu.memory_space<vmem>>, vector<8x16xf32>
    %c0_1 = arith.constant 0 : index
    %c0_2 = arith.constant 0 : index
    %1 = vector.load %arg1[%c0_1, %c0_2] : memref<128x128xbf16, #tpu.memory_space<vmem>>, vector<16x128xbf16>
    %2 = arith.truncf %0 : vector<8x16xf32> to vector<8x16xbf16>
    %cst = arith.constant dense<0.000000e+00> : vector<8x128xf32>
    %3 = tpu.matmul %2, %1, %cst {dimension_numbers = #tpu.dot_dimension_numbers<[1], [0], [0], [1], [0, 0, 1, 1], [], []>} : vector<8x16xbf16>, vector<16x128xbf16>, vector<8x128xf32> -> vector<8x128xf32>
    %c0_3 = arith.constant 0 : index
    %c0_4 = arith.constant 0 : index
    %4 = vector.load %arg2[%c0_3, %c0_4] : memref<4x128xf32, #tpu.memory_space<vmem>>, vector<1x128xf32>
    %5 = vector.broadcast %4 : vector<1x128xf32> to vector<8x128xf32>
    %6 = arith.addf %3, %5 : vector<8x128xf32>
    %cst_5 = arith.constant 0.000000e+00 : f32
    %7 = vector.broadcast %cst_5 : f32 to vector<8x128xf32>
    %8 = arith.maximumf %6, %7 : vector<8x128xf32>
    %c16 = arith.constant 16 : index
    %c0_6 = arith.constant 0 : index
    %9 = vector.load %arg1[%c16, %c0_6] : memref<128x128xbf16, #tpu.memory_space<vmem>>, vector<16x128xbf16>
    %10 = vector.extract_strided_slice %8 {offsets = [0, 0], sizes = [8, 16], strides = [1, 1]} : vector<8x128xf32> to vector<8x16xf32>
    %11 = arith.truncf %10 : vector<8x16xf32> to vector<8x16xbf16>
    %cst_7 = arith.constant dense<0.000000e+00> : vector<8x128xf32>
    %12 = tpu.matmul %11, %9, %cst_7 {dimension_numbers = #tpu.dot_dimension_numbers<[1], [0], [0], [1], [0, 0, 1, 1], [], []>} : vector<8x16xbf16>, vector<16x128xbf16>, vector<8x128xf32> -> vector<8x128xf32>
    %c1 = arith.constant 1 : index
    %c0_8 = arith.constant 0 : index
    %13 = vector.load %arg2[%c1, %c0_8] : memref<4x128xf32, #tpu.memory_space<vmem>>, vector<1x128xf32>
    %14 = vector.broadcast %13 : vector<1x128xf32> to vector<8x128xf32>
    %15 = arith.addf %12, %14 : vector<8x128xf32>
    %cst_9 = arith.constant 0.000000e+00 : f32
    %16 = vector.broadcast %cst_9 : f32 to vector<8x128xf32>
    %17 = arith.maximumf %15, %16 : vector<8x128xf32>
    %c32 = arith.constant 32 : index
    %c0_10 = arith.constant 0 : index
    %18 = vector.load %arg1[%c32, %c0_10] : memref<128x128xbf16, #tpu.memory_space<vmem>>, vector<32x128xbf16>
    %19 = vector.extract_strided_slice %17 {offsets = [0, 0], sizes = [8, 32], strides = [1, 1]} : vector<8x128xf32> to vector<8x32xf32>
    %20 = arith.truncf %19 : vector<8x32xf32> to vector<8x32xbf16>
    %cst_11 = arith.constant dense<0.000000e+00> : vector<8x128xf32>
    %21 = tpu.matmul %20, %18, %cst_11 {dimension_numbers = #tpu.dot_dimension_numbers<[1], [0], [0], [1], [0, 0, 1, 1], [], []>} : vector<8x32xbf16>, vector<32x128xbf16>, vector<8x128xf32> -> vector<8x128xf32>
    %c2 = arith.constant 2 : index
    %c0_12 = arith.constant 0 : index
    %22 = vector.load %arg2[%c2, %c0_12] : memref<4x128xf32, #tpu.memory_space<vmem>>, vector<1x128xf32>
    %23 = vector.broadcast %22 : vector<1x128xf32> to vector<8x128xf32>
    %24 = arith.addf %21, %23 : vector<8x128xf32>
    %cst_13 = arith.constant 0.000000e+00 : f32
    %25 = vector.broadcast %cst_13 : f32 to vector<8x128xf32>
    %26 = arith.maximumf %24, %25 : vector<8x128xf32>
    %c64 = arith.constant 64 : index
    %c0_14 = arith.constant 0 : index
    %27 = vector.load %arg1[%c64, %c0_14] : memref<128x128xbf16, #tpu.memory_space<vmem>>, vector<64x128xbf16>
    %28 = vector.extract_strided_slice %26 {offsets = [0, 0], sizes = [8, 64], strides = [1, 1]} : vector<8x128xf32> to vector<8x64xf32>
    %29 = arith.truncf %28 : vector<8x64xf32> to vector<8x64xbf16>
    %cst_15 = arith.constant dense<0.000000e+00> : vector<8x128xf32>
    %30 = tpu.matmul %29, %27, %cst_15 {dimension_numbers = #tpu.dot_dimension_numbers<[1], [0], [0], [1], [0, 0, 1, 1], [], []>} : vector<8x64xbf16>, vector<64x128xbf16>, vector<8x128xf32> -> vector<8x128xf32>
    %c3 = arith.constant 3 : index
    %c0_16 = arith.constant 0 : index
    %31 = vector.load %arg2[%c3, %c0_16] : memref<4x128xf32, #tpu.memory_space<vmem>>, vector<1x128xf32>
    %32 = vector.broadcast %31 : vector<1x128xf32> to vector<8x128xf32>
    %33 = arith.addf %30, %32 : vector<8x128xf32>
    %c0_17 = arith.constant 0 : index
    %c0_18 = arith.constant 0 : index
    %34 = vector.load %arg3[%c0_17, %c0_18] : memref<8x128xf32, #tpu.memory_space<vmem>>, vector<8x128xf32>
    tpu.vector_store %arg3[%c0_17, %c0_18], %33 {strides = array<i32>} : memref<8x128xf32, #tpu.memory_space<vmem>>, vector<8x128xf32>,
    return
  }
}

</mosaic_0001>

<bundles_post_ra>
// kernel: dummy_model_forward.1
= control target key start
LH: loop header
LB: loop body
LE: loop exit
PB: predicated region body
PF: predicated region fallthrough
CT: control target
= control target key end

     0   :  { %8 = vsyncpa [#allocation3], 0  ;;  %s506_s0 = inlined_call_operand.vmem [shape: f32[8,16], index: 0, kind: input, shape index: {}]   ;;  %s507_s1 = inlined_call_operand.hbm [shape: bf16[128,128], index: 1, kind: input, shape index: {}]   ;;  %s508_s2 = inlined_call_operand.vmem [shape: f32[4,128], index: 2, kind: input, shape index: {}]   ;;  %s509_s3 = inlined_call_operand.hbm [shape: f32[8,128], index: 3, kind: output, shape index: {}]  }
   0x1   :  { %9 = vsyncpa [#allocation4], 0  ;;  %s435_s12 = smov [#allocation2]   ;;  %s387_s16 = scalar_lea.hbm %s507_s1, 1024 }
   0x2   :  { %s17_s13 = sshll.u32 %s435_s12, 4  ;;  %p388_p0 = scmp.ne.s32.totalorder %s507_s1, %s387_s16  ;;  %s18_s13 = int_to_ptr.vmem [resolvable:$true] %s17_s13 }
   0x3   :  { %p391_p1 = scmp.lt.u32.totalorder %s387_s16, %s507_s1 }
   0x5   :  { %p393_p2 = pnand %p391_p1, %p388_p0 }
   0x7   :  { %396 = shalt.err (!%p393_p2)
}
   0x8   :  { %s397_s21 = scalar_lea.vmem %s18_s13, 1024  ;;  %p402_p4 = scmp.lt.s32.totalorder %s18_s13, %s18_s13 }
   0x9   :  { %p398_p3 = scmp.ne.s32.totalorder %s18_s13, %s397_s21  ;;  %p403_p5 = scmp.lt.s32.totalorder %s397_s21, %s397_s21 }
   0xb   :  { %p404_p6 = por %p403_p5, %p402_p4 }
   0xd   :  { %p405_p7 = pnand %p404_p6, %p398_p3 }
   0xf   :  { %408 = shalt.err (!%p405_p7)
}
  0x10   :  { %s436_s22 = smov 64   ;;  %s437_s23 = smov 4  }
  0x11   :  { %23 = dma.hbm_to_vmem [thread:$0]  %s507_s1, 1024, %s18_s13, [#allocation3], %s436_s22, %s436_s22, %s437_s23  }
  0x12   :  { %431 = dma.done.wait [#allocation3], 1024  }
  0x13   :  { %432 = vsyncadd [#allocation3], 4294966272  ;;  %v438_v0 = vmov 0.0   ;;  %vm439_vm0 = vmmov 0   ;;  %v379_v1 = vld [vmem:[#allocation2] sm:$0xff]   ;;  %v30_v2 = vld [vmem:[%s506_s0] sm:$0xff] }
  0x14   :  { %341 = vmatprep.subr.bf16.mxu0 %v438_v0  ;;  %343 = vmatprep.mubr.msk.bf16.mxu0 %vm439_vm0, %v438_v0  ;;  %vm45_vm1 = vcmask 130048   ;;  %v33_v3 = vpack.c.bf16 %v30_v2, %v30_v2  ;;  %v380_v4 = vld [vmem:[#allocation2 + $0x8] sm:$0xff]   ;;  %v381_v5 = vld [vmem:[#allocation2 + $0x10] sm:$0xff]   ;;  %v313_v6 = vld [vmem:[%s508_s2] ss:$0 sm:$0xff]  ;;  %vm170_vm2 = vcmask 261120  }
  0x15   :  { %347 = vmatprep.subr.bf16.mxu1 %v438_v0  ;;  %349 = vmatprep.mubr.msk.bf16.mxu1 %vm439_vm0, %v438_v0  ;;  %v382_v14 = vld [vmem:[#allocation2 + $0x18] sm:$0xff]   ;;  %v383_v15 = vld [vmem:[#allocation2 + $0x20] sm:$0xff]   ;;  %v384_v16 = vld [vmem:[#allocation2 + $0x28] sm:$0xff]   ;;  %vm253_vm3 = vcmask 523264   ;;  %s440_s7 = smov [#allocation5]  }
  0x16   :  { %342 = vmatpush3.bf16.msra.mxu0 %v379_v1  ;;  %348 = vmatpush3.bf16.msra.mxu1 %v380_v4  ;;  %v316_v17 = vld [vmem:[%s508_s2 + $0x1] ss:$0 sm:$0xff]  ;;  %v385_v25 = vld [vmem:[#allocation2 + $0x30] sm:$0xff]   ;;  %v319_v27 = vld [vmem:[%s508_s2 + $0x2] ss:$0 sm:$0xff]  ;;  %s304_s8 = sshll.u32 %s440_s7, 4  ;;  %s305_s8 = int_to_ptr.vmem [resolvable:$true] %s304_s8 }
  0x17   :  { %353 = vmatprep.subr.bf16.mxu0 %v438_v0  ;;  %361 = vmatprep.subr.bf16.mxu1 %v438_v0  ;;  %v386_v26 = vld [vmem:[#allocation2 + $0x38] sm:$0xff]   ;;  %s409_s9 = scalar_lea.vmem %s305_s8, 128  ;;  %p414_p9 = scmp.lt.s32.totalorder %s305_s8, %s305_s8 }
  0x18   :  { %v323_v35 = vld [vmem:[%s508_s2 + $0x3] ss:$0 sm:$0xff]  ;;  %p410_p8 = scmp.ne.s32.totalorder %s305_s8, %s409_s9  ;;  %p415_p10 = scmp.lt.s32.totalorder %s409_s9, %s409_s9 }
  0x19   :  { %344 = vmatmul.mubr.msk.bf16.vlgmr.msra.gmra.mrb[0].mxu0 %vm45_vm1, %v33_v3 }
  0x1a   :  { %357 = vmatprep.mubr.msk.bf16.mxu0 %vm439_vm0, %v438_v0  ;;  %354 = vmatpush3.bf16.msra.mxu0 %v381_v5  ;;  %p416_p11 = por %p415_p10, %p414_p9 }
  0x1b   :  { %355 = vmatprep.subr.bf16.mxu0 %v438_v0 }
  0x1c   :  { %p417_p12 = pnand %p416_p11, %p410_p8 }
  0x1e   :  { %356 = vmatpush3.bf16.msra.mxu0 %v382_v14 }
  0xec   :  { %v83_v7 = vpop.f32.mrb[0].mxu0 }
  0xed   :  { %v84_v8 = vadd.f32 %v313_v6, %v83_v7  ;;  %v345_v9 = vpop.f32.mrb[1].mxu0 }
  0xee   :  { %v86_v10 = vpop.f32.mrb[2].mxu0 }
  0xef   :  { %v89_v11 = vmax.f32 %v84_v8, 0.0  ;;  %v346_v12 = vpop.f32.mrb[3].mxu0 }
  0xf1   :  { %v92_v13 = vpack.c.bf16 %v89_v11, %v89_v11 }
  0xf3   :  { %350 = vmatmul.mubr.msk.bf16.vlgmr.msra.gmra.mrb[0].mxu1 %vm45_vm1, %v92_v13 }
  0xf4   :  { %369 = vmatprep.mubr.msk.bf16.mxu1 %vm439_vm0, %v438_v0  ;;  %362 = vmatpush3.bf16.msra.mxu1 %v383_v15 }
  0xf5   :  { %363 = vmatprep.subr.bf16.mxu1 %v438_v0 }
  0xf8   :  { %364 = vmatpush3.bf16.msra.mxu1 %v384_v16 }
  0xf9   :  { %365 = vmatprep.subr.bf16.mxu1 %v438_v0 }
  0xfc   :  { %366 = vmatpush3.bf16.msra.mxu1 %v385_v25 }
  0xfd   :  { %367 = vmatprep.subr.bf16.mxu1 %v438_v0 }
 0x100   :  { %368 = vmatpush3.bf16.msra.mxu1 %v386_v26 }
 0x1c6   :  { %v141_v18 = vpop.f32.mrb[0].mxu1 }
 0x1c7   :  { %v142_v19 = vadd.f32 %v316_v17, %v141_v18  ;;  %v351_v20 = vpop.f32.mrb[1].mxu1 }
 0x1c8   :  { %v144_v21 = vpop.f32.mrb[2].mxu1 }
 0x1c9   :  { %v147_v22 = vmax.f32 %v142_v19, 0.0  ;;  %v352_v23 = vpop.f32.mrb[3].mxu1 }
 0x1cb   :  { %v152_v24 = vpack.c.bf16 %v147_v22, %v147_v22 }
 0x1cd   :  { %358 = vmatmul.mubr.msk.bf16.vlgmr.msra.gmra.mrb[4].mxu0 %vm170_vm2, %v152_v24 }
 0x2a0   :  { %v208_v28 = vpop.f32.mrb[4].mxu0 }
 0x2a1   :  { %v209_v29 = vadd.f32 %v319_v27, %v208_v28  ;;  %v359_v30 = vpop.f32.mrb[5].mxu0 }
 0x2a2   :  { %v211_v31 = vpop.f32.mrb[6].mxu0 }
 0x2a3   :  { %v214_v32 = vmax.f32 %v209_v29, 0.0  ;;  %v360_v33 = vpop.f32.mrb[7].mxu0 }
 0x2a5   :  { %v223_v34 = vpack.c.bf16 %v214_v32, %v214_v32 }
 0x2a7   :  { %370 = vmatmul.mubr.msk.bf16.vlgmr.msra.gmra.mrb[4].mxu1 %vm253_vm3, %v223_v34 }
 0x37a   :  { %v291_v36 = vpop.f32.mrb[4].mxu1 }
 0x37b   :  { %v292_v37 = vadd.f32 %v323_v35, %v291_v36  ;;  %v371_v38 = vpop.f32.mrb[5].mxu1 }
 0x37c   :  { %v294_v39 = vpop.f32.mrb[6].mxu1 }
 0x37d   :  { %297 = vst [vmem:[#allocation5] sm:$0xff] %v292_v37  ;;  %v372_v40 = vpop.f32.mrb[7].mxu1 }
 0x37e   :  { %420 = shalt.err (!%p417_p12)
}
 0x37f   :  { %s421_s2 = scalar_lea.hbm %s509_s3, 128 }
 0x380   :  { %p422_p13 = scmp.ne.s32.totalorder %s509_s3, %s421_s2  ;;  %p425_p0 = scmp.lt.u32.totalorder %s421_s2, %s509_s3 }
 0x382   :  { %p427_p1 = pnand %p425_p0, %p422_p13 }
 0x384   :  { %430 = shalt.err (!%p427_p1)
}
 0x385   :  { %307 = dma.vmem_to_hbm [thread:$0]  %s305_s8, 128, %s509_s3, [#allocation4]  }
 0x386   :  { %433 = dma.done.wait [#allocation4], 128  }
 0x387   :  { %434 = vsyncadd [#allocation4], 4294967168 }
 0x388   :  { %311 = vsyncpa [#allocation3], 1 }
 0x389   :  { %312 = vsyncpa [#allocation4], 1 }

</bundles_post_ra>
